<compile_context>
chip_gen: v6e
topology: v6e:2x2x1
jax: 0.10.0
libtpu: 0.0.40
codegen_flags: <defaults>
</compile_context>

<pallas_src>
import functools
import math

import jax
import jax.numpy as jnp
from jax import lax
from jax.experimental import pallas as pl
from jax.experimental.pallas import tpu as pltpu


def _dice_partial_kernel(thr_ref, gt_ref, pred_ref, out_ref, *,
                         total, lane_width, need_mask):
    thr = thr_ref[0, 0]

    gt = gt_ref[...].astype(jnp.float32)              # (tr, L)
    pred = pred_ref[...].astype(jnp.float32)          # (tr, L)
    hit = pred > thr                                   # bool (tr, L)

    tr, L = gt.shape

    if need_mask:
        # Mask elements whose global flat index >= total.  Covers both the <L-element
        # zero pad (when total % L != 0) and garbage rows of a partial last block
        # (when rows % tr != 0).  Two-part compare avoids int32 overflow.
        full_rows = total // lane_width
        rem = total % lane_width
        row = (lax.broadcasted_iota(jnp.int32, (tr, L), 0)
               + pl.program_id(0) * tr)
        col = lax.broadcasted_iota(jnp.int32, (tr, L), 1)
        valid = (row < full_rows) | ((row == full_rows) & (col < rem))
        gt = jnp.where(valid, gt, 0.0)
        hit = jnp.logical_and(hit, valid)

    pred_bin = hit.astype(jnp.float32)
    inter = jnp.where(hit, gt, 0.0)                    # gt * pred_bin without a multiply
    union = gt + pred_bin                              # merged sum(gt) + sum(pred_bin)

    def to_row(x):                                     # (tr, L) -> (1, L)
        if tr % 8 == 0 and tr > 8:
            # Tile-aligned split: summing the group axis is pure elementwise VALU adds.
            x = x.reshape(tr // 8, 8, L).sum(axis=0)   # (8, L)
        return jnp.sum(x, axis=0, keepdims=True)       # sublane reduce (XLU), (1, L)

    out_ref[0, 0:1, :] = to_row(inter)
    out_ref[0, 1:2, :] = to_row(union)


def dice_metric(gt, pred, threshold=0.0, lane_width=512, rows_per_tile=1024):
    """Dice metric over all elements of gt / pred (same shape, any rank)."""
    assert gt.shape == pred.shape
    assert lane_width % 128 == 0
    L = lane_width
    total = math.prod(gt.shape)

    rows = -(-total // L)                               # ceil(total / L)
    pad = rows * L - total

    gt_flat = gt.reshape(-1)                            # free: contiguous reshape
    pred_flat = pred.reshape(-1)
    if pad:
        # Only hit when total % lane_width != 0; pads < lane_width zeros.  The fill
        # value is irrelevant because the kernel masks indices >= total.
        # TODO(synk): a fully pad-free path would need 1-D HBM refs + manual DMA.
        gt_flat = jnp.pad(gt_flat, (0, pad))
        pred_flat = jnp.pad(pred_flat, (0, pad))
    gt2 = gt_flat.reshape(rows, L)                      # lane-dense, native dtype
    pred2 = pred_flat.reshape(rows, L)

    # Sublane multiple for the narrowest streamed dtype (8 / 16 / 32 for 32/16/8-bit).
    sm = max(8, 32 // jnp.dtype(gt.dtype).itemsize,
             32 // jnp.dtype(pred.dtype).itemsize)
    if rows <= rows_per_tile:
        tr = rows                                       # full-dim block: always legal
    else:
        tr = max(sm, (rows_per_tile // sm) * sm)
    num_tiles = -(-rows // tr)
    need_mask = (num_tiles * tr * L) != total

    thr = jnp.full((1, 1), threshold, dtype=jnp.float32)

    kernel = functools.partial(_dice_partial_kernel,
                               total=total, lane_width=L, need_mask=need_mask)

    itemsz = jnp.dtype(gt.dtype).itemsize + jnp.dtype(pred.dtype).itemsize
    blk_bytes = tr * L * itemsz                         # both input blocks, one step
    vmem_limit = max(32 << 20, 2 * blk_bytes + (4 << 20))   # double-buffer + headroom

    partials = pl.pallas_call(
        kernel,
        out_shape=jax.ShapeDtypeStruct((num_tiles, 2, L), jnp.float32),
        grid_spec=pltpu.PrefetchScalarGridSpec(
            num_scalar_prefetch=0,
            grid=(num_tiles,),
            in_specs=[
                pl.BlockSpec(memory_space=pltpu.MemorySpace.SMEM),   # threshold (1,1)
                pl.BlockSpec((tr, L), lambda i: (i, 0)),
                pl.BlockSpec((tr, L), lambda i: (i, 0)),
            ],
            out_specs=pl.BlockSpec((1, 2, L), lambda i: (i, 0, 0)),
        ),
        compiler_params=pltpu.CompilerParams(
            dimension_semantics=("parallel",),          # independent tiles -> megacore
            vmem_limit_bytes=vmem_limit,
        ),
        cost_estimate=pl.CostEstimate(
            flops=8 * total,
            transcendentals=0,
            bytes_accessed=total * itemsz + num_tiles * 2 * L * 4,
        ),
    )(thr, gt2, pred2)

    intersection = jnp.sum(partials[:, 0, :])
    union = jnp.sum(partials[:, 1, :])
    return 2.0 * intersection / (union + jnp.float32(1e-6))


def _reference(gt, pred, threshold=0.0):
    pred_bin = (pred > threshold).astype(jnp.float32)
    gt = gt.astype(jnp.float32)
    intersection = jnp.sum(gt * pred_bin)
    union = jnp.sum(gt) + jnp.sum(pred_bin)
    return 2.0 * intersection / (union + 1e-6)


if __name__ == "__main__":
    key = jax.random.PRNGKey(0)
    k1, k2, k3, k4 = jax.random.split(key, 4)

    # Case 1: NCHW (2, 4, 16, 16) — total is a multiple of 512: no pad, no mask.
    gt1 = (jax.random.uniform(k1, (2, 4, 16, 16)) > 0.5).astype(jnp.float32)
    pred1 = jax.random.normal(k2, (2, 4, 16, 16), dtype=jnp.float32)
    d1 = jax.block_until_ready(dice_metric(gt1, pred1, threshold=0.0))
    r1 = _reference(gt1, pred1, threshold=0.0)
    assert jnp.allclose(d1, r1, rtol=1e-5, atol=1e-6), (d1, r1)

    # Case 2: ragged total (3, 5, 7, 11) — exercises in-kernel tail masking and a
    # non-zero threshold passed through SMEM.
    gt2 = (jax.random.uniform(k3, (3, 5, 7, 11)) > 0.5).astype(jnp.float32)
    pred2 = jax.random.normal(k4, (3, 5, 7, 11), dtype=jnp.float32)
    d2 = jax.block_until_ready(dice_metric(gt2, pred2, threshold=0.25))
    r2 = _reference(gt2, pred2, threshold=0.25)
    assert jnp.allclose(d2, r2, rtol=1e-5, atol=1e-6), (d2, r2)

    print("KERNEL_OK")
</pallas_src>

<mosaic_0001>
module attributes {stable_mosaic.version = 11 : i64} {
  func.func @_dice_partial_kernel(%arg0: i32, %arg1: memref<1x1xf32, #tpu.memory_space<smem>>, %arg2: memref<4x512xf32, #tpu.memory_space<vmem>>, %arg3: memref<4x512xf32, #tpu.memory_space<vmem>>, %arg4: memref<1x2x512xf32, #tpu.memory_space<vmem>>) attributes {dimension_semantics = [#tpu.dimension_semantics<parallel>], iteration_bounds = array<i64: 1>, scalar_prefetch = 0 : i64, scratch_operands = 0 : i64, tpu.core_type = #tpu.core_type<tc>, window_params = [{transform_indices = @transform_0, window_bounds = array<i64: 1, 1>}, {transform_indices = @transform_1, window_bounds = array<i64: 4, 512>}, {transform_indices = @transform_2, window_bounds = array<i64: 4, 512>}, {transform_indices = @transform_3, window_bounds = array<i64: 1, 2, 512>}]} {
    %c0 = arith.constant 0 : index
    %c0_0 = arith.constant 0 : index
    %0 = memref.load %arg1[%c0, %c0_0] : memref<1x1xf32, #tpu.memory_space<smem>>
    %c0_1 = arith.constant 0 : index
    %c0_2 = arith.constant 0 : index
    %1 = vector.load %arg2[%c0_1, %c0_2] : memref<4x512xf32, #tpu.memory_space<vmem>>, vector<4x512xf32>
    %c0_3 = arith.constant 0 : index
    %c0_4 = arith.constant 0 : index
    %2 = vector.load %arg3[%c0_3, %c0_4] : memref<4x512xf32, #tpu.memory_space<vmem>>, vector<4x512xf32>
    %3 = vector.broadcast %0 : f32 to vector<4x512xf32>
    %4 = arith.cmpf ogt, %2, %3 : vector<4x512xf32>
    %5 = arith.extui %4 : vector<4x512xi1> to vector<4x512xi32>
    %6 = arith.sitofp %5 : vector<4x512xi32> to vector<4x512xf32>
    %cst = arith.constant 0.000000e+00 : f32
    %7 = vector.broadcast %cst : f32 to vector<4x512xf32>
    %8 = arith.select %4, %1, %7 : vector<4x512xi1>, vector<4x512xf32>
    %9 = arith.addf %1, %6 : vector<4x512xf32>
    %cst_5 = arith.constant dense<0.000000e+00> : vector<512xf32>
    %10 = vector.multi_reduction <add>, %8, %cst_5 [0] : vector<4x512xf32> to vector<512xf32>
    %11 = vector.shape_cast %10 : vector<512xf32> to vector<1x512xf32>
    %c0_6 = arith.constant 0 : index
    %c0_7 = arith.constant 0 : index
    %c0_8 = arith.constant 0 : index
    %12 = vector.load %arg4[%c0_6, %c0_7, %c0_8] : memref<1x2x512xf32, #tpu.memory_space<vmem>>, vector<1x1x512xf32>
    %13 = vector.shape_cast %12 : vector<1x1x512xf32> to vector<1x512xf32>
    %14 = vector.shape_cast %11 : vector<1x512xf32> to vector<1x1x512xf32>
    tpu.vector_store %arg4[%c0_6, %c0_7, %c0_8], %14 {strides = array<i32>} : memref<1x2x512xf32, #tpu.memory_space<vmem>>, vector<1x1x512xf32>,
    %cst_9 = arith.constant dense<0.000000e+00> : vector<512xf32>
    %15 = vector.multi_reduction <add>, %9, %cst_9 [0] : vector<4x512xf32> to vector<512xf32>
    %16 = vector.shape_cast %15 : vector<512xf32> to vector<1x512xf32>
    %c0_10 = arith.constant 0 : index
    %c1 = arith.constant 1 : index
    %c0_11 = arith.constant 0 : index
    %17 = vector.load %arg4[%c0_10, %c1, %c0_11] : memref<1x2x512xf32, #tpu.memory_space<vmem>>, vector<1x1x512xf32>
    %18 = vector.shape_cast %17 : vector<1x1x512xf32> to vector<1x512xf32>
    %19 = vector.shape_cast %16 : vector<1x512xf32> to vector<1x1x512xf32>
    tpu.vector_store %arg4[%c0_10, %c1, %c0_11], %19 {strides = array<i32>} : memref<1x2x512xf32, #tpu.memory_space<vmem>>, vector<1x1x512xf32>,
    return
  }
  func.func @transform_0(%arg0: i32) -> (i32, i32) {
    %c0_i32 = arith.constant 0 : i32
    %c0_i32_0 = arith.constant 0 : i32
    %c0_i32_1 = arith.constant 0 : i32
    return %c0_i32, %c0_i32_0 : i32, i32
  }
  func.func @transform_1(%arg0: i32) -> (i32, i32) {
    %c0_i32 = arith.constant 0 : i32
    %c0_i32_0 = arith.constant 0 : i32
    return %arg0, %c0_i32 : i32, i32
  }
  func.func @transform_2(%arg0: i32) -> (i32, i32) {
    %c0_i32 = arith.constant 0 : i32
    %c0_i32_0 = arith.constant 0 : i32
    return %arg0, %c0_i32 : i32, i32
  }
  func.func @transform_3(%arg0: i32) -> (i32, i32, i32) {
    %c0_i32 = arith.constant 0 : i32
    %c0_i32_0 = arith.constant 0 : i32
    %c0_i32_1 = arith.constant 0 : i32
    return %arg0, %c0_i32, %c0_i32_0 : i32, i32, i32
  }
}

</mosaic_0001>

<bundles_post_ra>
// kernel: tpu_custom_call.1
= control target key start
LH: loop header
LB: loop body
LE: loop exit
PB: predicated region body
PF: predicated region fallthrough
CT: control target
= control target key end

     0   :  { %9 = vsyncpa [#allocation4], 0  ;;  %s326_s0 = inlined_call_operand.<no memory space> [shape: f32[1,1], index: 0, kind: input, shape index: {}]   ;;  %s327_s1 = inlined_call_operand.hbm [shape: f32[4,512], index: 1, kind: input, shape index: {}]   ;;  %s328_s2 = inlined_call_operand.hbm [shape: f32[4,512], index: 2, kind: input, shape index: {}]   ;;  %s329_s3 = inlined_call_operand.hbm [shape: f32[1,2,512], index: 3, kind: output, shape index: {}]  }
   0x1   :  { %10 = vsyncpa [#allocation7], 0 }
   0x2   :  { %11 = vsyncpa [#allocation5], 0  ;;  %s279_s12 = smov [#allocation3]   ;;  %s280_s14 = smov [#allocation6]  }
   0x3   :  { %s20_s13 = sshll.u32 %s279_s12, 4  ;;  %s30_s15 = sshll.u32 %s280_s14, 4  ;;  %s21_s13 = int_to_ptr.vmem [resolvable:$true] %s20_s13  ;;  %s31_s15 = int_to_ptr.vmem [resolvable:$true] %s30_s15 }
   0x4   :  { %s221_s16 = scalar_lea.vmem %s21_s13, 256  ;;  %p226_p1 = scmp.lt.s32.totalorder %s21_s13, %s21_s13 }
   0x5   :  { %p222_p0 = scmp.ne.s32.totalorder %s21_s13, %s221_s16  ;;  %p227_p2 = scmp.lt.s32.totalorder %s221_s16, %s221_s16 }
   0x7   :  { %p228_p3 = por %p227_p2, %p226_p1 }
   0x9   :  { %p229_p4 = pnand %p228_p3, %p222_p0 }
   0xb   :  { %232 = shalt.err (!%p229_p4)
}
   0xc   :  { %23 = dma.hbm_to_vmem [thread:$0]  %s327_s1, 256, %s21_s13, [#allocation4]  }
   0xd   :  { %s241_s19 = scalar_lea.vmem %s31_s15, 256  ;;  %p246_p6 = scmp.lt.s32.totalorder %s31_s15, %s31_s15 }
   0xe   :  { %p242_p5 = scmp.ne.s32.totalorder %s31_s15, %s241_s19  ;;  %p247_p7 = scmp.lt.s32.totalorder %s241_s19, %s241_s19 }
  0x10   :  { %p248_p8 = por %p247_p7, %p246_p6 }
  0x12   :  { %p249_p9 = pnand %p248_p8, %p242_p5 }
  0x14   :  { %252 = shalt.err (!%p249_p9)
}
  0x15   :  { %33 = dma.hbm_to_vmem [thread:$0]  %s328_s2, 256, %s31_s15, [#allocation7]  }
  0x16   :  { %273 = dma.done.wait [#allocation4], 256  }
  0x17   :  { %274 = vsyncadd [#allocation4], 4294967040 }
  0x18   :  { %275 = dma.done.wait [#allocation7], 256  }
  0x19   :  { %276 = vsyncadd [#allocation7], 4294967040  ;;  %v45_v0 = vstv %s326_s0  ;;  %v100_v1 = vlaneseq  ;;  %v41_v2 = vld [vmem:[#allocation3] sm:$0xff]  ;;  %v42_v3 = vld [vmem:[#allocation3 + $0x8] sm:$0xff]  ;;  %vm62_vm0 = vcmask 1043456   ;;  %v282_v10 = vmov 0.0  }
  0x1a   :  { %v43_v4 = vld [vmem:[#allocation6] sm:$0xff]  ;;  %v44_v5 = vld [vmem:[#allocation6 + $0x8] sm:$0xff]  ;;  %v281_v6 = vmov 1966171168   ;;  %s283_s0 = smov [#allocation8]  }
  0x1b   :  { %vm46_vm1 = vcmp.gt.f32.partialorder %v43_v4, %v45_v0  ;;  %v98_v7 = vunpack.c.l.s4 %v281_v6  ;;  %vm47_vm2 = vcmp.gt.f32.partialorder %v44_v5, %v45_v0  ;;  %v101_v9 = vshrl.u32 %v100_v1, 7  ;;  %s196_s1 = sshll.u32 %s283_s0, 4  ;;  %s197_s1 = int_to_ptr.vmem [resolvable:$true] %s196_s1 }
  0x1c   :  { %v52_v8 = vsel %vm46_vm1, %v41_v2, 0.0  ;;  %v206_v11 = vsel %vm46_vm1, 1.0, %v282_v10  ;;  %v53_v12 = vsel %vm47_vm2, %v42_v3, 0.0  ;;  %v207_v15 = vsel %vm47_vm2, 1.0, %v282_v10  ;;  %s253_s2 = scalar_lea.vmem %s197_s1, 128  ;;  %p258_p11 = scmp.lt.s32.totalorder %s197_s1, %s197_s1 }
  0x1d   :  { %v58_v13 = vcombine.high %v52_v8, %v52_v8  ;;  %v63_v14 = vsel %vm62_vm0, %v52_v8, 0.0  ;;  %v59_v16 = vcombine.high %v53_v12, %v53_v12  ;;  %v77_v18 = vsel %vm62_vm0, %v53_v12, 0.0  ;;  %p254_p10 = scmp.ne.s32.totalorder %s197_s1, %s253_s2  ;;  %p259_p12 = scmp.lt.s32.totalorder %s253_s2, %s253_s2 }
  0x1e   :  { %v64_v17 = vrot.slane %v63_v14, 4  ;;  %v54_v19 = vadd.f32 %v206_v11, %v41_v2  ;;  %v78_v21 = vrot.slane %v77_v18, 4  ;;  %v99_v22 = vunpack.c.0.s8 %v98_v7 }
  0x1f   :  { %v70_v20 = vsel %vm62_vm0, %v58_v13, 0.0  ;;  %v55_v23 = vadd.f32 %v207_v15, %v42_v3  ;;  %v84_v26 = vsel %vm62_vm0, %v59_v16, 0.0  ;;  %vm122_vm3 = vcmp.lt.s32.totalorder %v100_v1, 512  ;;  %p260_p13 = por %p259_p12, %p258_p11 }
  0x20   :  { %v65_v24 = vadd.f32 %v64_v17, %v63_v14  ;;  %v71_v25 = vrot.slane %v70_v20, 4  ;;  %v127_v27 = vcombine.high %v54_v19, %v54_v19  ;;  %v79_v28 = vadd.f32 %v78_v21, %v77_v18 }
  0x21   :  { %v85_v29 = vrot.slane %v84_v26, 4  ;;  %v128_v30 = vcombine.high %v55_v23, %v55_v23  ;;  %v131_v31 = vsel %vm62_vm0, %v54_v19, 0.0  ;;  %v145_v39 = vsel %vm62_vm0, %v55_v23, 0.0  ;;  %p261_p0 = pnand %p260_p13, %p254_p10 }
  0x22   :  { %v66_v32 = vrot.slane %v65_v24, 2  ;;  %v72_v33 = vadd.f32 %v71_v25, %v70_v20  ;;  %v132_v34 = vrot.slane %v131_v31, 4  ;;  %v138_v35 = vsel %vm62_vm0, %v127_v27, 0.0 }
  0x23   :  { %v80_v36 = vrot.slane %v79_v28, 2  ;;  %v86_v37 = vadd.f32 %v85_v29, %v84_v26  ;;  %v139_v38 = vrot.slane %v138_v35, 4  ;;  %v146_v43 = vrot.slane %v145_v39, 4 }
  0x24   :  { %v67_v40 = vadd.f32 %v66_v32, %v65_v24  ;;  %v73_v41 = vrot.slane %v72_v33, 2  ;;  %v133_v42 = vadd.f32 %v132_v34, %v131_v31  ;;  %v152_v47 = vsel %vm62_vm0, %v128_v30, 0.0 }
  0x25   :  { %v81_v44 = vadd.f32 %v80_v36, %v79_v28  ;;  %v87_v45 = vrot.slane %v86_v37, 2  ;;  %v140_v46 = vadd.f32 %v139_v38, %v138_v35  ;;  %v147_v51 = vadd.f32 %v146_v43, %v145_v39 }
  0x26   :  { %v68_v48 = vrot.slane %v67_v40, 1  ;;  %v74_v49 = vadd.f32 %v73_v41, %v72_v33  ;;  %v134_v50 = vrot.slane %v133_v42, 2  ;;  %v153_v55 = vrot.slane %v152_v47, 4 }
  0x27   :  { %v82_v52 = vrot.slane %v81_v44, 1  ;;  %v88_v53 = vadd.f32 %v87_v45, %v86_v37  ;;  %v141_v54 = vrot.slane %v140_v46, 2  ;;  %v148_v59 = vrot.slane %v147_v51, 2 }
  0x28   :  { %v69_v56 = vadd.f32 %v68_v48, %v67_v40  ;;  %v75_v57 = vrot.slane %v74_v49, 1  ;;  %v135_v58 = vadd.f32 %v134_v50, %v133_v42  ;;  %v154_v63 = vadd.f32 %v153_v55, %v152_v47 }
  0x29   :  { %v83_v60 = vadd.f32 %v82_v52, %v81_v44  ;;  %v89_v61 = vrot.slane %v88_v53, 1  ;;  %v142_v62 = vadd.f32 %v141_v54, %v140_v46  ;;  %v102_v2 = vsub.s32 %v99_v22, %v101_v9 }
  0x2a   :  { %v76_v0 = vadd.f32 %v75_v57, %v74_v49  ;;  %v136_v3 = vrot.slane %v135_v58, 1  ;;  %v149_v4 = vadd.f32 %v148_v59, %v147_v51  ;;  %v155_v7 = vrot.slane %v154_v63, 2 }
  0x2b   :  { %v90_v5 = vadd.f32 %v89_v61, %v88_v53  ;;  %v143_v6 = vrot.slane %v142_v62, 1 }
  0x2c   :  { %v95_v8 = vcombine.low %v69_v56, %v76_v0  ;;  %v137_v10 = vadd.f32 %v136_v3, %v135_v58  ;;  %v150_v11 = vrot.slane %v149_v4, 1  ;;  %v156_v14 = vadd.f32 %v155_v7, %v154_v63 }
  0x2d   :  { %v96_v12 = vcombine.low %v83_v60, %v90_v5  ;;  %v144_v13 = vadd.f32 %v143_v6, %v142_v62 }
  0x2e   :  { %v103_v15 = vrot.slane %v95_v8, %v102_v2  ;;  %v151_v17 = vadd.f32 %v150_v11, %v149_v4  ;;  %v157_v18 = vrot.slane %v156_v14, 1 }
  0x2f   :  { %v110_v16 = vrot.slane %v96_v12, %v102_v2  ;;  %v163_v19 = vcombine.low %v137_v10, %v144_v13 }
  0x30   :  { %v158_v21 = vadd.f32 %v157_v18, %v156_v14 }
  0x31   :  { %v111_v20 = vcombine.low %v103_v15, %v110_v16  ;;  %v171_v23 = vrot.slane %v163_v19, %v102_v2 }
  0x32   :  { %v164_v22 = vcombine.low %v151_v17, %v158_v21 }
  0x33   :  { %v118_v9 = vrot.slane %v111_v20, %v102_v2 }
  0x34   :  { %v178_v24 = vrot.slane %v164_v22, %v102_v2 }
  0x35   :  { %124 = vst.msk [vmem:[#allocation8] ss:$2 sm:$0xf] %vm122_vm3, %v118_v9 }
  0x36   :  { %v179_v25 = vcombine.low %v171_v23, %v178_v24 }
  0x38   :  { %v186_v26 = vrot.slane %v179_v25, %v102_v2 }
  0x3a   :  { %189 = vst.msk [vmem:[#allocation8 + $0x1] ss:$2 sm:$0xf] %vm122_vm3, %v186_v26 }
  0x3b   :  { %264 = shalt.err (!%p261_p0)
}
  0x3c   :  { %199 = dma.vmem_to_hbm [thread:$0]  %s197_s1, 128, %s329_s3, [#allocation5]  }
  0x3d   :  { %277 = dma.done.wait [#allocation5], 128  }
  0x3e   :  { %278 = vsyncadd [#allocation5], 4294967168 }
  0x3f   :  { %203 = vsyncpa [#allocation4], 1 }
  0x40   :  { %204 = vsyncpa [#allocation7], 1 }
  0x41   :  { %205 = vsyncpa [#allocation5], 1 }

</bundles_post_ra>
